<compile_context>
chip_gen: v7x
topology: tpu7x:2x2x1
jax: 0.10.0
libtpu: 0.0.40
codegen_flags: <defaults>
</compile_context>

<pallas_src>
import functools

import jax
import jax.numpy as jnp
from jax.experimental import pallas as pl
from jax.experimental.pallas import tpu as pltpu

_LANES = 128            # vreg lane width (minor dim)
_SUBLANES = 8           # f32 sublanes per vreg (second-minor dim)
_SENTINEL_LOGIT = -1e4  # with label 0: max(x,0)=0, x*y=0, log1p(exp(-1e4))=0
_MIB = 1024 * 1024


def _cdiv(a: int, b: int) -> int:
    return -(-a // b)


def _sublane_multiple(dtype) -> int:
    # Second-minor tiling requirement for a (rows, 128) block of this dtype:
    # f32 -> 8, bf16/f16 -> 16, int8/bool -> 32.
    return max(_SUBLANES, 32 // jnp.dtype(dtype).itemsize)


def _device_defaults():
    """Generation-aware (max_tile_rows, vmem_limit_bytes, num_splits)."""
    try:
        kind = jax.devices()[0].device_kind.lower()
    except Exception:
        kind = ""
    if "v7" in kind or "7x" in kind:
        # 2 TensorCores, 64 MiB physical VMEM, 3.2 TB/s HBM: 2 MiB blocks keep
        # the 0.35 us/step overhead ~10-15%, and the parallel split shards the
        # stream across both cores.
        return 4096, 48 * _MIB, 2
    if "v6" in kind:
        # 1 TC, 128 MiB VMEM: bigger blocks buy the last few % of roofline.
        return 8192, 64 * _MIB, 1
    # v5e (820 GB/s) and everything else: 1 MiB blocks already hide the
    # per-step overhead; bytes moved is the only meaningful lever.
    return 2048, 32 * _MIB, 1


def _bce_with_logits_kernel(x_ref, y_ref, out_ref, *,
                            tile_rows, rows_in_last_block, last_s, last_k):
    s = pl.program_id(0)   # 'parallel' split (v7x: one per TensorCore)
    k = pl.program_id(1)   # 'arbitrary' reduction step within the split

    # Output block is resident across the k axis -> accumulator.
    @pl.when(k == 0)
    def _init():
        out_ref[...] = jnp.zeros_like(out_ref)

    # Upcast in-register; inputs travel HBM->VMEM in their native dtype.
    x = x_ref[...].astype(jnp.float32)
    y = y_ref[...].astype(jnp.float32)

    # Numerically stable BCE-with-logits (same formulation PyTorch uses).
    loss = jnp.maximum(x, 0.0) - x * y + jnp.log1p(jnp.exp(-jnp.abs(x)))

    def _accumulate(vals):
        # Collapse (tile_rows, 128) -> one (8, 128) vreg-shaped partial with
        # pure VALU adds (no cross-lane/sublane XLU work in the hot loop).
        out_ref[...] += vals.reshape(
            tile_rows // _SUBLANES, _SUBLANES, _LANES).sum(axis=0)

    if rows_in_last_block < tile_rows:
        # Only the single, globally-last block can contain out-of-bounds rows
        # (unspecified / possibly NaN data).  Mask it there and only there;
        # every other grid step runs the unmasked fast path.
        is_tail = (s == last_s) & (k == last_k)

        @pl.when(is_tail)
        def _tail():
            rows = jax.lax.broadcasted_iota(jnp.int32, loss.shape, 0)
            _accumulate(jnp.where(rows < rows_in_last_block, loss, 0.0))

        @pl.when(jnp.logical_not(is_tail))
        def _body():
            _accumulate(loss)
    else:
        _accumulate(loss)


def bce_with_logits_loss(logits: jax.Array, labels: jax.Array, *,
                         max_tile_rows: int | None = None,
                         num_splits: int | None = None,
                         vmem_limit_bytes: int | None = None) -> jax.Array:
    """Pallas TPU implementation of nn.BCEWithLogitsLoss() (mean reduction).

    Args:
      logits: [batch_size, 1] raw logits (any float dtype; upcast in-kernel).
      labels: [batch_size, 1] binary labels (float / int / bool; 0 or 1).
      max_tile_rows / num_splits / vmem_limit_bytes: None -> generation-aware
        defaults (see _device_defaults).
    Returns:
      Scalar float32 loss.
    """
    assert logits.shape == labels.shape, (logits.shape, labels.shape)
    n = int(logits.size)
    assert n > 0

    d_tile, d_vmem, d_splits = _device_defaults()
    max_tile_rows = d_tile if max_tile_rows is None else max_tile_rows
    vmem_limit_bytes = d_vmem if vmem_limit_bytes is None else vmem_limit_bytes
    num_splits = d_splits if num_splits is None else num_splits

    # Sublane multiple the block shape must respect for both input dtypes.
    mult = max(_sublane_multiple(logits.dtype), _sublane_multiple(labels.dtype))
    max_tile_rows = max(mult, max_tile_rows - max_tile_rows % mult)

    rows_total = _cdiv(n, _LANES)
    if rows_total < mult:
        # Tiny input: pad up to one minimal block (a few KiB at most).
        rows = mult
        tile_rows = mult
    else:
        rows = rows_total
        # Largest mult-aligned tile that never exceeds the array's row count,
        # so at most the final block is a (masked) partial edge block.
        tile_rows = min(max_tile_rows, rows_total - rows_total % mult)

    # Native-dtype, lane-dense [rows, 128] view.  Copy-free whenever
    # n % 128 == 0; otherwise only a <=127-element (or tiny-input) sentinel pad
    # whose per-element loss is exactly 0.0, so the hot loop needs no mask.
    x = logits.reshape(-1)
    y = labels.reshape(-1)
    pad = rows * _LANES - n
    if pad:
        x = jnp.pad(x, (0, pad), constant_values=_SENTINEL_LOGIT)
        y = jnp.pad(y, (0, pad))
    x = x.reshape(rows, _LANES)
    y = y.reshape(rows, _LANES)

    total_blocks = _cdiv(rows, tile_rows)
    # Use the parallel split only when it divides the work exactly (avoids
    # all-padding splits; on single-TC chips the default is already 1).
    ns = num_splits if (num_splits > 1 and total_blocks % num_splits == 0) else 1
    steps = total_blocks // ns
    rows_in_last_block = rows - (total_blocks - 1) * tile_rows

    kernel = functools.partial(
        _bce_with_logits_kernel,
        tile_rows=tile_rows,
        rows_in_last_block=rows_in_last_block,
        last_s=ns - 1,
        last_k=steps - 1,
    )

    in_map = lambda s, k: (s * steps + k, 0)

    partials = pl.pallas_call(
        kernel,
        out_shape=jax.ShapeDtypeStruct((ns * _SUBLANES, _LANES), jnp.float32),
        grid=(ns, steps),
        in_specs=[
            pl.BlockSpec((tile_rows, _LANES), in_map),
            pl.BlockSpec((tile_rows, _LANES), in_map),
        ],
        # One (8, 128) partial-sum block per split: full-width unmasked stores.
        out_specs=pl.BlockSpec((_SUBLANES, _LANES), lambda s, k: (s, 0)),
        compiler_params=pltpu.CompilerParams(
            dimension_semantics=("parallel", "arbitrary"),
            vmem_limit_bytes=vmem_limit_bytes,
        ),
    )(x, y)

    # Final tiny collapse + mean over the *true* element count.
    return jnp.sum(partials) / jnp.float32(n)


def _reference_bce_with_logits(logits, labels):
    x = logits.astype(jnp.float32).reshape(-1)
    y = labels.astype(jnp.float32).reshape(-1)
    per_elem = jnp.maximum(x, 0.0) - x * y + jnp.log1p(jnp.exp(-jnp.abs(x)))
    return jnp.mean(per_elem)


if __name__ == "__main__":
    key = jax.random.PRNGKey(0)
    k1, k2, k3, k4, k5, k6 = jax.random.split(key, 6)

    # 1) Module-shaped small case: [batch_size, 1] f32 -> single (1, 1) grid step.
    B = 8
    logits = jax.random.normal(k1, (B, 1), dtype=jnp.float32) * 2.0
    labels = (jax.random.uniform(k2, (B, 1)) > 0.5).astype(jnp.float32)
    loss = jax.block_until_ready(bce_with_logits_loss(logits, labels))
    ref = jax.block_until_ready(_reference_bce_with_logits(logits, labels))
    assert jnp.allclose(loss, ref, atol=1e-5, rtol=1e-5), (loss, ref)

    # 2) Multi-step reduction + sentinel lane padding + pl.when-gated tail mask.
    B2 = 3000
    logits2 = jax.random.normal(k3, (B2, 1), dtype=jnp.float32) * 3.0
    labels2 = (jax.random.uniform(k4, (B2, 1)) > 0.5).astype(jnp.float32)
    loss2 = jax.block_until_ready(
        bce_with_logits_loss(logits2, labels2, max_tile_rows=16, num_splits=1))
    ref2 = jax.block_until_ready(_reference_bce_with_logits(logits2, labels2))
    assert jnp.allclose(loss2, ref2, atol=1e-5, rtol=1e-5), (loss2, ref2)

    # 3) Zero-copy path (n % 128 == 0) with an explicit 2-way 'parallel' split.
    B3 = 4096
    logits3 = jax.random.normal(k5, (B3, 1), dtype=jnp.float32) * 2.0
    labels3 = (jax.random.uniform(k6, (B3, 1)) > 0.5).astype(jnp.float32)
    loss3 = jax.block_until_ready(
        bce_with_logits_loss(logits3, labels3, max_tile_rows=8, num_splits=2))
    ref3 = jax.block_until_ready(_reference_bce_with_logits(logits3, labels3))
    assert jnp.allclose(loss3, ref3, atol=1e-5, rtol=1e-5), (loss3, ref3)

    # 4) Native-dtype pass-through: bf16 logits, no wrapper astype / f32 prepass.
    logits4 = logits3.astype(jnp.bfloat16)
    loss4 = jax.block_until_ready(bce_with_logits_loss(logits4, labels3))
    ref4 = jax.block_until_ready(_reference_bce_with_logits(logits4, labels3))
    assert jnp.allclose(loss4, ref4, atol=1e-5, rtol=1e-5), (loss4, ref4)

    print("KERNEL_OK")
</pallas_src>

<mosaic_0001>
module attributes {stable_mosaic.version = 11 : i64} {
  func.func @_bce_with_logits_kernel(%arg0: i32, %arg1: i32, %arg2: memref<8x128xf32, #tpu.memory_space<vmem>>, %arg3: memref<8x128xf32, #tpu.memory_space<vmem>>, %arg4: memref<8x128xf32, #tpu.memory_space<vmem>>) attributes {dimension_semantics = [#tpu.dimension_semantics<parallel>, #tpu.dimension_semantics<arbitrary>], iteration_bounds = array<i64: 1, 1>, scalar_prefetch = 0 : i64, scratch_operands = 0 : i64, tpu.core_type = #tpu.core_type<tc>, window_params = [{transform_indices = @transform_0, window_bounds = array<i64: 8, 128>}, {transform_indices = @transform_1, window_bounds = array<i64: 8, 128>}, {transform_indices = @transform_2, window_bounds = array<i64: 8, 128>}]} {
    %c0_i32 = arith.constant 0 : i32
    %0 = arith.cmpi eq, %arg1, %c0_i32 : i32
    %1 = arith.extui %0 : i1 to i32
    %c0_i32_0 = arith.constant 0 : i32
    %2 = arith.cmpi ne, %1, %c0_i32_0 : i32
    scf.if %2 {
      %cst_10 = arith.constant 0.000000e+00 : f32
      %20 = vector.broadcast %cst_10 : f32 to vector<8x128xf32>
      %c0_11 = arith.constant 0 : index
      %c0_12 = arith.constant 0 : index
      %21 = vector.load %arg4[%c0_11, %c0_12] : memref<8x128xf32, #tpu.memory_space<vmem>>, vector<8x128xf32>
      tpu.vector_store %arg4[%c0_11, %c0_12], %20 {strides = array<i32>} : memref<8x128xf32, #tpu.memory_space<vmem>>, vector<8x128xf32>,
    } else {
    }
    %c0 = arith.constant 0 : index
    %c0_1 = arith.constant 0 : index
    %3 = vector.load %arg2[%c0, %c0_1] : memref<8x128xf32, #tpu.memory_space<vmem>>, vector<8x128xf32>
    %c0_2 = arith.constant 0 : index
    %c0_3 = arith.constant 0 : index
    %4 = vector.load %arg3[%c0_2, %c0_3] : memref<8x128xf32, #tpu.memory_space<vmem>>, vector<8x128xf32>
    %cst = arith.constant 0.000000e+00 : f32
    %5 = vector.broadcast %cst : f32 to vector<8x128xf32>
    %6 = arith.maximumf %3, %5 : vector<8x128xf32>
    %7 = arith.mulf %3, %4 : vector<8x128xf32>
    %8 = arith.subf %6, %7 : vector<8x128xf32>
    %9 = math.absf %3 : vector<8x128xf32>
    %cst_4 = arith.constant 0.000000e+00 : f32
    %10 = vector.broadcast %cst_4 : f32 to vector<8x128xf32>
    %11 = arith.subf %10, %9 : vector<8x128xf32>
    %12 = math.exp %11 : vector<8x128xf32>
    %13 = math.log1p %12 : vector<8x128xf32>
    %14 = arith.addf %8, %13 : vector<8x128xf32>
    %c0_5 = arith.constant 0 : index
    %c0_6 = arith.constant 0 : index
    %15 = vector.load %arg4[%c0_5, %c0_6] : memref<8x128xf32, #tpu.memory_space<vmem>>, vector<8x128xf32>
    %16 = vector.shape_cast %14 : vector<8x128xf32> to vector<1x8x128xf32>
    %cst_7 = arith.constant dense<0.000000e+00> : vector<8x128xf32>
    %17 = vector.multi_reduction <add>, %16, %cst_7 [0] : vector<1x8x128xf32> to vector<8x128xf32>
    %18 = arith.addf %15, %17 : vector<8x128xf32>
    %c0_8 = arith.constant 0 : index
    %c0_9 = arith.constant 0 : index
    %19 = vector.load %arg4[%c0_8, %c0_9] : memref<8x128xf32, #tpu.memory_space<vmem>>, vector<8x128xf32>
    tpu.vector_store %arg4[%c0_8, %c0_9], %18 {strides = array<i32>} : memref<8x128xf32, #tpu.memory_space<vmem>>, vector<8x128xf32>,
    return
  }
  func.func @transform_0(%arg0: i32, %arg1: i32) -> (i32, i32) {
    %c1_i32 = arith.constant 1 : i32
    %0 = arith.muli %arg0, %c1_i32 : i32
    %1 = arith.addi %0, %arg1 : i32
    %c0_i32 = arith.constant 0 : i32
    %c0_i32_0 = arith.constant 0 : i32
    return %1, %c0_i32 : i32, i32
  }
  func.func @transform_1(%arg0: i32, %arg1: i32) -> (i32, i32) {
    %c1_i32 = arith.constant 1 : i32
    %0 = arith.muli %arg0, %c1_i32 : i32
    %1 = arith.addi %0, %arg1 : i32
    %c0_i32 = arith.constant 0 : i32
    %c0_i32_0 = arith.constant 0 : i32
    return %1, %c0_i32 : i32, i32
  }
  func.func @transform_2(%arg0: i32, %arg1: i32) -> (i32, i32) {
    %c0_i32 = arith.constant 0 : i32
    %c0_i32_0 = arith.constant 0 : i32
    return %arg0, %c0_i32 : i32, i32
  }
}

</mosaic_0001>

<bundles_post_ra>
// kernel: tpu_custom_call.1
= control target key start
LH: loop header
LB: loop body
LE: loop exit
PB: predicated region body
PF: predicated region fallthrough
CT: control target
= control target key end

     0   :  { %7 = vsyncpa [#allocation3], 0  ;;  %s222_s0 = inlined_call_operand.hbm [shape: f32[8,128], index: 0, kind: input, shape index: {}]   ;;  %s223_s1 = inlined_call_operand.hbm [shape: f32[8,128], index: 1, kind: input, shape index: {}]   ;;  %s224_s2 = inlined_call_operand.hbm [shape: f32[8,128], index: 2, kind: output, shape index: {}]  }
   0x1   :  { %8 = vsyncpa [#allocation6], 0 }
   0x2   :  { %9 = vsyncpa [#allocation4], 0  ;;  %s168_s9 = smov [#allocation2]   ;;  %s169_s11 = smov [#allocation5]  }
   0x3   :  { %s19_s10 = sshll.u32 %s168_s9, 4  ;;  %s32_s12 = sshll.u32 %s169_s11, 4  ;;  %s20_s10 = int_to_ptr.vmem [resolvable:$true] %s19_s10  ;;  %s33_s12 = int_to_ptr.vmem [resolvable:$true] %s32_s12 }
   0x4   :  { %s96_s15 = scalar_lea.hbm %s222_s0, 128 }
   0x5   :  { %p97_p0 = scmp.ne.s32.totalorder %s222_s0, %s96_s15  ;;  %p100_p1 = scmp.lt.u32.totalorder %s96_s15, %s222_s0 }
   0x7   :  { %p102_p2 = pnand %p100_p1, %p97_p0 }
   0x9   :  { %105 = shalt.err (!%p102_p2)
}
   0xa   :  { %s106_s20 = scalar_lea.vmem %s20_s10, 128  ;;  %p111_p4 = scmp.lt.s32.totalorder %s20_s10, %s20_s10 }
   0xb   :  { %p107_p3 = scmp.ne.s32.totalorder %s20_s10, %s106_s20  ;;  %p112_p5 = scmp.lt.s32.totalorder %s106_s20, %s106_s20 }
   0xd   :  { %p113_p6 = por %p112_p5, %p111_p4 }
   0xf   :  { %p114_p7 = pnand %p113_p6, %p107_p3 }
  0x11   :  { %117 = shalt.err (!%p114_p7)
}
  0x12   :  { %22 = dma.hbm_to_vmem [thread:$0]  %s222_s0, 128, %s20_s10, [#allocation3]  }
  0x13   :  { %s118_s25 = scalar_lea.hbm %s223_s1, 128 }
  0x14   :  { %p119_p8 = scmp.ne.s32.totalorder %s223_s1, %s118_s25  ;;  %p122_p9 = scmp.lt.u32.totalorder %s118_s25, %s223_s1 }
  0x16   :  { %p124_p10 = pnand %p122_p9, %p119_p8 }
  0x18   :  { %127 = shalt.err (!%p124_p10)
}
  0x19   :  { %s128_s30 = scalar_lea.vmem %s33_s12, 128  ;;  %p133_p12 = scmp.lt.s32.totalorder %s33_s12, %s33_s12 }
  0x1a   :  { %p129_p11 = scmp.ne.s32.totalorder %s33_s12, %s128_s30  ;;  %p134_p13 = scmp.lt.s32.totalorder %s128_s30, %s128_s30 }
  0x1c   :  { %p135_p0 = por %p134_p13, %p133_p12 }
  0x1e   :  { %p136_p1 = pnand %p135_p0, %p129_p11 }
  0x20   :  { %139 = shalt.err (!%p136_p1)
}
  0x21   :  { %35 = dma.hbm_to_vmem [thread:$0]  %s223_s1, 128, %s33_s12, [#allocation6]  }
  0x22   :  { %162 = dma.done.wait [#allocation3], 128  }
  0x23   :  { %163 = vsyncadd [#allocation3], 4294967168 }
  0x24   :  { %164 = dma.done.wait [#allocation6], 128  }
  0x25   :  { %165 = vsyncadd [#allocation6], 4294967168  ;;  %v49_v0 = vld [vmem:[#allocation2] sm:$0xff]  ;;  %v50_v7 = vld [vmem:[#allocation5] sm:$0xff]  ;;  %s170_s1 = smov [#allocation7]  }
  0x26   :  { %v54_v1 = vand.u32 2147483647, %v49_v0  ;;  %v51_v9 = vmax.f32 %v49_v0, 0.0  ;;  %v52_v10 = vmul.f32 %v50_v7, %v49_v0  ;;  %s78_s4 = sshll.u32 %s170_s1, 4  ;;  %s79_s4 = int_to_ptr.vmem [resolvable:$true] %s78_s4 }
  0x27   :  { %s140_s5 = scalar_lea.vmem %s79_s4, 128  ;;  %p145_p3 = scmp.lt.s32.totalorder %s79_s4, %s79_s4 }
  0x28   :  { %v55_v2 = vsub.f32 0.0, %v54_v1  ;;  %v53_v14 = vsub.f32 %v51_v9, %v52_v10  ;;  %p141_p2 = scmp.ne.s32.totalorder %s79_s4, %s140_s5  ;;  %p146_p4 = scmp.lt.s32.totalorder %s140_s5, %s140_s5 }
  0x2a   :  { %v56_v3 = vmul.f32 1.442695, %v55_v2  ;;  %p147_p5 = por %p146_p4, %p145_p3 }
  0x2c   :  { %92 = vpow2.f32 %v56_v3  ;;  %p148_p6 = pnand %p147_p5, %p141_p2 }
  0x36   :  { %v93_v4 = vpop.eup %92 }
  0x37   :  { %v58_v5 = vadd.f32 1.0, %v93_v4  ;;  %v61_v6 = vmul.f32 -0.5, %v93_v4  ;;  %v64_v11 = vand.u32 2147483647, %v93_v4 }
  0x39   :  { %94 = vlog2.f32 %v58_v5  ;;  %v62_v8 = vadd.f32 1.0, %v61_v6  ;;  %vm65_vm0 = vcmp.lt.f32.partialorder %v64_v11, 0.0004427343 }
  0x3b   :  { %v63_v12 = vmul.f32 %v93_v4, %v62_v8 }
  0x43   :  { %v95_v13 = vpop.eup %94 }
  0x44   :  { %v60_v15 = vmul.f32 0.6931472, %v95_v13 }
  0x46   :  { %v66_v16 = vsel %vm65_vm0, %v63_v12, %v60_v15 }
  0x47   :  { %v67_v17 = vadd.f32 %v66_v16, %v53_v14 }
  0x49   :  { %71 = vst [vmem:[#allocation7] sm:$0xff] %v67_v17 }
  0x4a   :  { %151 = shalt.err (!%p148_p6)
}
  0x4b   :  { %s152_s8 = scalar_lea.hbm %s224_s2, 128 }
  0x4c   :  { %p153_p7 = scmp.ne.s32.totalorder %s224_s2, %s152_s8  ;;  %p156_p8 = scmp.lt.u32.totalorder %s152_s8, %s224_s2 }
  0x4e   :  { %p158_p9 = pnand %p156_p8, %p153_p7 }
  0x50   :  { %161 = shalt.err (!%p158_p9)
}
  0x51   :  { %81 = dma.vmem_to_hbm [thread:$0]  %s79_s4, 128, %s224_s2, [#allocation4]  }
  0x52   :  { %166 = dma.done.wait [#allocation4], 128  }
  0x53   :  { %167 = vsyncadd [#allocation4], 4294967168 }
  0x54   :  { %85 = vsyncpa [#allocation3], 1 }
  0x55   :  { %86 = vsyncpa [#allocation6], 1 }
  0x56   :  { %87 = vsyncpa [#allocation4], 1 }

</bundles_post_ra>
